<compile_context>
chip_gen: v5e
topology: v5e:2x2
jax: 0.10.0
libtpu: 0.0.40
codegen_flags: <defaults>
</compile_context>

<pallas_src>
import jax
import jax.numpy as jnp
from jax.experimental import pallas as pl
from jax.experimental.pallas import tpu as pltpu


def _add_pos_kernel(x_ref, pos_ref, o_ref):
    # x_ref / o_ref: (tB, tR, W);  pos_ref: (tR, W) -> broadcasts over the
    # batch axis.  Pure VPU elementwise add; the kernel is memory bound.
    o_ref[...] = (x_ref[...] + pos_ref[...]).astype(o_ref.dtype)


def _sublane_min(dtype):
    # Sublane packing granularity: f32 -> 8 rows/vreg, bf16/f16 -> 16, int8/fp8 -> 32.
    return {4: 8, 2: 16, 1: 32}.get(jnp.dtype(dtype).itemsize, 8)


def _round_up(n, m):
    return ((n + m - 1) // m) * m


def _pick_fold(S, D, sub_req):
    """Pick Sc | S so that W = Sc*D is lane-dense (multiple of 128) while
    Sr = S // Sc keeps sublanes fillable; prefer the largest Sr."""
    best_key, best = None, (1, S, D)
    for sc in range(1, S + 1):
        if S % sc:
            continue
        sr, w = S // sc, sc * D
        key = (w % 128 == 0, sr % sub_req == 0, sr >= sub_req, -sc)
        if best_key is None or key > best_key:
            best_key, best = key, (sc, sr, w)
    return best  # (Sc, Sr, W)


def learnable_positional_encoding(x, pos_embedding, *, target_tile_bytes=4 * 1024 * 1024):
    """x: (B, S, D); pos_embedding: (max_len, D).  Returns x + pos_embedding[:S]."""
    B, S, D = x.shape
    max_len, d_model = pos_embedding.shape
    assert D == d_model, f"d_model mismatch: x has {D}, table has {d_model}"
    # nn.Embedding would error on out-of-range positions; don't silently clamp.
    assert S <= max_len, f"seq_len {S} exceeds max_len {max_len}"

    out_dtype = jnp.promote_types(x.dtype, pos_embedding.dtype)
    it_x = jnp.dtype(x.dtype).itemsize
    it_p = jnp.dtype(pos_embedding.dtype).itemsize
    it_o = jnp.dtype(out_dtype).itemsize
    # Sublane granularity keeping every participating array unpadded.
    sub_req = max(_sublane_min(x.dtype), _sublane_min(pos_embedding.dtype),
                  _sublane_min(out_dtype))

    # ---- layout: fold seq positions onto lanes / rows -----------------------
    Sc, Sr, W = _pick_fold(S, D, sub_req)
    padW = _round_up(W, 128)

    # ---- batch tiling (only needed for very large B*W) ----------------------
    if B > 1 and B * sub_req * padW * it_x > target_tile_bytes:
        tB = max(1, target_tile_bytes // (sub_req * padW * it_x))
        while B % tB:               # prefer a divisor of B (no partial batch block)
            tB -= 1
    else:
        tB = B
    nB = B // tB

    # ---- row tiling (padding-aware) ------------------------------------------
    # Double-buffered VMEM cost per tR row (x + out tiles over tB batches plus
    # the shared pos tile); cap tiles so the working set stays well under every
    # generation's VMEM (v7x: 64 MiB physical).
    per_row_ws = 2 * padW * (tB * (it_x + it_o) + it_p)
    rows_budget = max(1, min(target_tile_bytes // max(1, tB * padW * it_x),
                             (36 * 1024 * 1024) // per_row_ws))

    x_total_bytes = B * S * D * it_x
    need_steps = 4 if x_total_bytes >= 2 * target_tile_bytes else 1
    need_r_steps = -(-need_steps // nB)  # ceil

    divisors = [d for d in range(1, Sr + 1)
                if Sr % d == 0 and d % sub_req == 0 and d <= rows_budget]
    good = [d for d in divisors if (Sr // d) >= need_r_steps]
    if good:
        tR = max(good)              # largest full-divisor tile meeting the step count
    elif divisors:
        tR = max(divisors)
    elif Sr <= rows_budget:
        tR = Sr                     # full dim (allowed by the (8,128) rule)
    else:
        # No sublane-aligned divisor fits the budget: accept a partial last block.
        tR = max(sub_req, (rows_budget // sub_req) * sub_req)
    nR = pl.cdiv(Sr, tR)
    grid = (nR, nB)

    # ---- exact padded, double-buffered working set -> VMEM limit ------------
    padR_x = _round_up(tR, _sublane_min(x.dtype))
    padR_o = _round_up(tR, _sublane_min(out_dtype))
    padR_p = _round_up(tR, _sublane_min(pos_embedding.dtype))
    working_set = (2 * tB * padR_x * padW * it_x
                   + 2 * tB * padR_o * padW * it_o
                   + 2 * padR_p * padW * it_p)
    vmem_limit = min(64 * 1024 * 1024,
                     max(2 * 1024 * 1024, _round_up(int(working_set * 1.25), 1 << 20)))

    # ---- launch --------------------------------------------------------------
    x3 = x.reshape(B, Sr, W)                       # free, layout-preserving reshape
    pos3 = pos_embedding[:S].reshape(Sr, W)        # static slice + free reshape

    # Alias the output onto x when dtypes match: no second B*S*D HBM buffer.
    alias = {0: 0} if x.dtype == out_dtype else {}

    out3 = pl.pallas_call(
        _add_pos_kernel,
        out_shape=jax.ShapeDtypeStruct((B, Sr, W), out_dtype),
        grid_spec=pltpu.PrefetchScalarGridSpec(
            num_scalar_prefetch=0,
            grid=grid,
            in_specs=[
                pl.BlockSpec((tB, tR, W), lambda r, b: (b, r, 0)),  # x tile
                pl.BlockSpec((tR, W), lambda r, b: (r, 0)),         # shared pos tile
            ],
            out_specs=pl.BlockSpec((tB, tR, W), lambda r, b: (b, r, 0)),
        ),
        compiler_params=pltpu.CompilerParams(
            # All blocks are independent; with >=4 steps for large inputs both
            # v7x TensorCores get work while each still double-buffers.
            dimension_semantics=("parallel", "parallel"),
            vmem_limit_bytes=vmem_limit,
        ),
        input_output_aliases=alias,
    )(x3, pos3)

    return out3.reshape(B, S, D)


if __name__ == "__main__":
    # Small shapes consistent with the module: batch=2, seq=8, d_model=32.
    B, S, D = 2, 8, 32
    max_len = 64  # module default is 5000; a small synthetic table is sufficient

    key = jax.random.PRNGKey(0)
    kx, kp = jax.random.split(key)
    x = jax.random.normal(kx, (B, S, D), dtype=jnp.float32)
    # Deterministic stand-in for the learnable nn.Embedding weight table.
    pos_embedding = jax.random.normal(kp, (max_len, D), dtype=jnp.float32)

    # Reference (same semantics as the PyTorch forward); computed before the
    # kernel call since the kernel may alias/donate x's buffer.
    ref = x + pos_embedding[:S][None, :, :]

    out = learnable_positional_encoding(x, pos_embedding)
    out = jax.block_until_ready(out)

    assert out.shape == (B, S, D)
    assert out.dtype == jnp.promote_types(x.dtype, pos_embedding.dtype)
    assert jnp.allclose(out, ref, atol=1e-6), "mismatch vs reference"

    print("KERNEL_OK")
</pallas_src>

<mosaic_0001>
module attributes {stable_mosaic.version = 11 : i64} {
  func.func @_add_pos_kernel(%arg0: i32, %arg1: i32, %arg2: memref<2x2x128xf32, #tpu.memory_space<vmem>>, %arg3: memref<2x128xf32, #tpu.memory_space<vmem>>, %arg4: memref<2x2x128xf32, #tpu.memory_space<vmem>>) attributes {dimension_semantics = [#tpu.dimension_semantics<parallel>, #tpu.dimension_semantics<parallel>], iteration_bounds = array<i64: 1, 1>, scalar_prefetch = 0 : i64, scratch_operands = 0 : i64, tpu.core_type = #tpu.core_type<tc>, window_params = [{transform_indices = @transform_0, window_bounds = array<i64: 2, 2, 128>}, {transform_indices = @transform_1, window_bounds = array<i64: 2, 128>}, {transform_indices = @transform_2, window_bounds = array<i64: 2, 2, 128>}]} {
    %c0 = arith.constant 0 : index
    %c0_0 = arith.constant 0 : index
    %c0_1 = arith.constant 0 : index
    %0 = vector.load %arg2[%c0, %c0_0, %c0_1] : memref<2x2x128xf32, #tpu.memory_space<vmem>>, vector<2x2x128xf32>
    %c0_2 = arith.constant 0 : index
    %c0_3 = arith.constant 0 : index
    %1 = vector.load %arg3[%c0_2, %c0_3] : memref<2x128xf32, #tpu.memory_space<vmem>>, vector<2x128xf32>
    %2 = vector.shape_cast %1 : vector<2x128xf32> to vector<1x2x128xf32>
    %3 = vector.broadcast %2 : vector<1x2x128xf32> to vector<2x2x128xf32>
    %4 = arith.addf %0, %3 : vector<2x2x128xf32>
    %c0_4 = arith.constant 0 : index
    %c0_5 = arith.constant 0 : index
    %c0_6 = arith.constant 0 : index
    %5 = vector.load %arg4[%c0_4, %c0_5, %c0_6] : memref<2x2x128xf32, #tpu.memory_space<vmem>>, vector<2x2x128xf32>
    tpu.vector_store %arg4[%c0_4, %c0_5, %c0_6], %4 {strides = array<i32>} : memref<2x2x128xf32, #tpu.memory_space<vmem>>, vector<2x2x128xf32>,
    return
  }
  func.func @transform_0(%arg0: i32, %arg1: i32) -> (i32, i32, i32) {
    %c0_i32 = arith.constant 0 : i32
    %c0_i32_0 = arith.constant 0 : i32
    return %arg1, %arg0, %c0_i32 : i32, i32, i32
  }
  func.func @transform_1(%arg0: i32, %arg1: i32) -> (i32, i32) {
    %c0_i32 = arith.constant 0 : i32
    %c0_i32_0 = arith.constant 0 : i32
    return %arg0, %c0_i32 : i32, i32
  }
  func.func @transform_2(%arg0: i32, %arg1: i32) -> (i32, i32, i32) {
    %c0_i32 = arith.constant 0 : i32
    %c0_i32_0 = arith.constant 0 : i32
    return %arg1, %arg0, %c0_i32 : i32, i32, i32
  }
}

</mosaic_0001>

<bundles_post_ra>
// kernel: tpu_custom_call.1
= control target key start
LH: loop header
LB: loop body
LE: loop exit
PB: predicated region body
PF: predicated region fallthrough
CT: control target
= control target key end

     0   :  { %7 = vsyncpa [#allocation3], 0  ;;  %s138_s0 = inlined_call_operand.hbm [shape: f32[2,2,128], index: 0, kind: input, shape index: {}, may-alias: {0,2}]   ;;  %s139_s1 = inlined_call_operand.vmem [shape: f32[2,128], index: 1, kind: input, shape index: {}]   ;;  %s140_s2 = inlined_call_operand.hbm [shape: f32[2,2,128], index: 2, kind: output, shape index: {}, may-alias: {0,2}]  }
   0x1   :  { %8 = vsyncpa [#allocation4], 0  ;;  %s13_s11 = sshll.u32 %s138_s0, 4  ;;  %s110_s12 = smov [#allocation2]   ;;  %s14_s11 = int_to_ptr.hbm [resolvable:$true] %s13_s11 }
   0x2   :  { %s15_s13 = sshll.u32 %s110_s12, 4  ;;  %s111_s14 = smov 32   ;;  %s16_s13 = int_to_ptr.vmem [resolvable:$true] %s15_s13 }
   0x3   :  { %s112_s15 = smov 2  }
   0x4   :  { %21 = dma.hbm_to_vmem [thread:$0]  %s14_s11, 64, %s16_s13, [#allocation3], %s111_s14, %s111_s14, %s112_s15  }
   0x5   :  { %106 = dma.done.wait [#allocation3], 64  }
   0x6   :  { %107 = vsyncadd [#allocation3], 4294967232  ;;  %s113_s16 = smov [#allocation5]   ;;  %s41_s20 = sshll.u32 %s140_s2, 4  ;;  %v28_v0 = vld [vmem:[#allocation2] sm:$0x3]  ;;  %s42_s20 = int_to_ptr.hbm [resolvable:$true] %s41_s20 }
   0x7   :  { %s39_s17 = sshll.u32 %s113_s16, 4  ;;  %v30_v1 = vld [vmem:[%s139_s1] sm:$0x3]  ;;  %v29_v2 = vld [vmem:[#allocation2 + $0x2] sm:$0x3]  ;;  %s40_s17 = int_to_ptr.vmem [resolvable:$true] %s39_s17 }
   0x8   :  { %v31_v3 = vadd.f32 %v30_v1, %v28_v0  ;;  %v32_v4 = vadd.f32 %v30_v1, %v29_v2 }
   0xa   :  { %33 = vst [vmem:[#allocation5] sm:$0x3] %v31_v3 }
   0xb   :  { %34 = vst [vmem:[#allocation5 + $0x2] sm:$0x3] %v32_v4 }
   0xc   :  { %47 = dma.vmem_to_hbm [thread:$0]  %s40_s17, 64, %s42_s20, [#allocation4], %s111_s14, %s111_s14, %s112_s15  }
   0xd   :  { %108 = dma.done.wait [#allocation4], 64  }
   0xe   :  { %109 = vsyncadd [#allocation4], 4294967232 }
   0xf   :  { %52 = vsyncpa [#allocation3], 1 }
  0x10   :  { %53 = vsyncpa [#allocation4], 1 }

</bundles_post_ra>
